<compile_context>
chip_gen: v7x
topology: tpu7x:2x2x1
jax: 0.10.0
libtpu: 0.0.40
codegen_flags: <defaults>
</compile_context>

<pallas_src>
import math

import jax
import jax.numpy as jnp
from jax.experimental import pallas as pl
from jax.experimental.pallas import tpu as pltpu


def pinn_p_kernel(x_ref,
                  w1_ref, b1_ref,
                  w2_ref, b2_ref,
                  w3_ref, b3_ref,
                  w4_ref, b4_ref,
                  o_ref):
    """Fused MLP forward for one batch tile (batch on the lane axis).

    x_ref:  (din, TB)            o_ref: (1, TB)
    wk_ref: (out_k, in_k)        bk_ref: (out_k, 1)
    """
    x = x_ref[...]

    def linear(w_ref, b_ref, h):
        # (out, in) @ (in, TB) -> (out, TB), f32 accumulation on the MXU.
        return jnp.dot(w_ref[...], h,
                       preferred_element_type=jnp.float32) + b_ref[...]

    def swish(h):
        return h * jax.nn.sigmoid(h)

    h = swish(linear(w1_ref, b1_ref, x))
    h = swish(linear(w2_ref, b2_ref, h))
    h = swish(linear(w3_ref, b3_ref, h))
    o_ref[...] = linear(w4_ref, b4_ref, h).astype(o_ref.dtype)   # final: no activation


def pinn_p_forward(x, params, *, tile_b=512):
    """x: (N, dim_input) float32; params: list of (W_(in,out), b_(out,)) pairs.

    Returns (N, out_dim) float32, matching `x @ W + b` semantics per layer.
    """
    n, din = x.shape
    num_tiles = pl.cdiv(n, tile_b)
    n_pad = num_tiles * tile_b

    # Batch -> lane axis: feed the kernel x^T, zero-padded to a full tile.
    xt = x.T                                    # (din, n)
    if n_pad != n:
        xt = jnp.pad(xt, ((0, 0), (0, n_pad - n)))

    flat_inputs = [xt]
    in_specs = [pl.BlockSpec((din, tile_b), lambda i: (0, i))]
    for w, b in params:
        wt = w.T                                # (out, in)
        b2d = b.reshape(-1, 1)                  # (out, 1) broadcasts over lanes
        flat_inputs += [wt, b2d]
        # Weights/biases are tiny: full-array blocks, same tile every step.
        in_specs += [pl.BlockSpec(wt.shape, lambda i: (0, 0)),
                     pl.BlockSpec(b2d.shape, lambda i: (0, 0))]

    out_dim = params[-1][0].shape[1]

    # Advisory cost estimate for XLA scheduling around the custom call.
    widths = [din] + [w.shape[1] for w, _ in params]
    macs_per_sample = sum(a * b for a, b in zip(widths[:-1], widths[1:]))
    sigmoids_per_sample = sum(widths[1:-1])
    param_bytes = sum(w.size * 4 + b.size * 4 for w, b in params)
    cost = pl.CostEstimate(
        flops=2 * n_pad * macs_per_sample,
        transcendentals=n_pad * sigmoids_per_sample,
        bytes_accessed=4 * n_pad * (din + out_dim) + param_bytes,
    )

    out_t = pl.pallas_call(
        pinn_p_kernel,
        out_shape=jax.ShapeDtypeStruct((out_dim, n_pad), jnp.float32),
        grid_spec=pltpu.PrefetchScalarGridSpec(
            num_scalar_prefetch=0,
            grid=(num_tiles,),
            in_specs=in_specs,
            out_specs=pl.BlockSpec((out_dim, tile_b), lambda i: (0, i)),
        ),
        compiler_params=pltpu.CompilerParams(
            dimension_semantics=("parallel",)),
        cost_estimate=cost,
    )(*flat_inputs)

    # Lane-dense (out_dim, n_pad) slab -> (N, out_dim), dropping the padding.
    return out_t[:, :n].T


def xavier_uniform(key, fan_in, fan_out, dtype=jnp.float32):
    bound = math.sqrt(6.0 / (fan_in + fan_out))
    return jax.random.uniform(key, (fan_in, fan_out), dtype=dtype,
                              minval=-bound, maxval=bound)


def init_params(key, layer_sizes):
    """Deterministic xavier_uniform weights, zero biases (matches module init)."""
    params = []
    for i in range(len(layer_sizes) - 1):
        key, sub = jax.random.split(key)
        w = xavier_uniform(sub, layer_sizes[i], layer_sizes[i + 1])
        b = jnp.zeros((layer_sizes[i + 1],), jnp.float32)
        params.append((w, b))
    return params


def pinn_p_reference(x, params):
    """Plain-JAX reference for correctness checking."""
    h = x
    for w, b in params[:-1]:
        h = h @ w + b
        h = h * jax.nn.sigmoid(h)
    w, b = params[-1]
    return h @ w + b


if __name__ == "__main__":
    key = jax.random.PRNGKey(0)
    key_x, key_p = jax.random.split(key)

    dim_input = 3
    hidden = 32          # small stand-in for the original nn = 220
    layer_sizes = [dim_input, hidden, hidden, hidden, 1]
    batch = 300          # deliberately NOT a multiple of tile_b: exercises cdiv + padding

    x = jax.random.normal(key_x, (batch, dim_input), dtype=jnp.float32)
    params = init_params(key_p, layer_sizes)

    out = pinn_p_forward(x, params, tile_b=128)   # grid = 3 (>1, shards on v7x)
    out = jax.block_until_ready(out)

    ref = pinn_p_reference(x, params)
    assert out.shape == (batch, 1)
    assert jnp.allclose(out, ref, atol=1e-5, rtol=1e-5)

    print("KERNEL_OK")
</pallas_src>

<mosaic_0001>
module attributes {stable_mosaic.version = 11 : i64} {
  func.func @pinn_p_kernel(%arg0: i32, %arg1: memref<3x128xf32, #tpu.memory_space<vmem>>, %arg2: memref<32x3xf32, #tpu.memory_space<vmem>>, %arg3: memref<32x1xf32, #tpu.memory_space<vmem>>, %arg4: memref<32x32xf32, #tpu.memory_space<vmem>>, %arg5: memref<32x1xf32, #tpu.memory_space<vmem>>, %arg6: memref<32x32xf32, #tpu.memory_space<vmem>>, %arg7: memref<32x1xf32, #tpu.memory_space<vmem>>, %arg8: memref<1x32xf32, #tpu.memory_space<vmem>>, %arg9: memref<1x1xf32, #tpu.memory_space<vmem>>, %arg10: memref<1x128xf32, #tpu.memory_space<vmem>>) attributes {dimension_semantics = [#tpu.dimension_semantics<parallel>], iteration_bounds = array<i64: 3>, scalar_prefetch = 0 : i64, scratch_operands = 0 : i64, tpu.core_type = #tpu.core_type<tc>, window_params = [{transform_indices = @transform_0, window_bounds = array<i64: 3, 128>}, {pipeline_mode = #tpu.pipeline_mode<synchronous>, transform_indices = @transform_1, window_bounds = array<i64: 32, 3>}, {pipeline_mode = #tpu.pipeline_mode<synchronous>, transform_indices = @transform_2, window_bounds = array<i64: 32, 1>}, {pipeline_mode = #tpu.pipeline_mode<synchronous>, transform_indices = @transform_3, window_bounds = array<i64: 32, 32>}, {pipeline_mode = #tpu.pipeline_mode<synchronous>, transform_indices = @transform_4, window_bounds = array<i64: 32, 1>}, {pipeline_mode = #tpu.pipeline_mode<synchronous>, transform_indices = @transform_5, window_bounds = array<i64: 32, 32>}, {pipeline_mode = #tpu.pipeline_mode<synchronous>, transform_indices = @transform_6, window_bounds = array<i64: 32, 1>}, {pipeline_mode = #tpu.pipeline_mode<synchronous>, transform_indices = @transform_7, window_bounds = array<i64: 1, 32>}, {pipeline_mode = #tpu.pipeline_mode<synchronous>, transform_indices = @transform_8, window_bounds = array<i64: 1, 1>}, {transform_indices = @transform_9, window_bounds = array<i64: 1, 128>}]} {
    %c0 = arith.constant 0 : index
    %c0_0 = arith.constant 0 : index
    %0 = vector.load %arg1[%c0, %c0_0] : memref<3x128xf32, #tpu.memory_space<vmem>>, vector<3x128xf32>
    %c0_1 = arith.constant 0 : index
    %c0_2 = arith.constant 0 : index
    %1 = vector.load %arg2[%c0_1, %c0_2] : memref<32x3xf32, #tpu.memory_space<vmem>>, vector<32x3xf32>
    %cst = arith.constant dense<0.000000e+00> : vector<32x128xf32>
    %2 = tpu.matmul %1, %0, %cst {dimension_numbers = #tpu.dot_dimension_numbers<[1], [0], [0], [1], [0, 0, 1, 1], [], []>} : vector<32x3xf32>, vector<3x128xf32>, vector<32x128xf32> -> vector<32x128xf32>
    %c0_3 = arith.constant 0 : index
    %c0_4 = arith.constant 0 : index
    %3 = vector.load %arg3[%c0_3, %c0_4] : memref<32x1xf32, #tpu.memory_space<vmem>>, vector<32x1xf32>
    %4 = vector.broadcast %3 : vector<32x1xf32> to vector<32x128xf32>
    %5 = arith.addf %2, %4 : vector<32x128xf32>
    %6 = arith.negf %5 : vector<32x128xf32>
    %7 = math.exp %6 : vector<32x128xf32>
    %cst_5 = arith.constant 1.000000e+00 : f32
    %8 = vector.broadcast %cst_5 : f32 to vector<32x128xf32>
    %9 = arith.addf %8, %7 : vector<32x128xf32>
    %10 = arith.divf %8, %9 : vector<32x128xf32>
    %11 = arith.mulf %5, %10 : vector<32x128xf32>
    %c0_6 = arith.constant 0 : index
    %c0_7 = arith.constant 0 : index
    %12 = vector.load %arg4[%c0_6, %c0_7] : memref<32x32xf32, #tpu.memory_space<vmem>>, vector<32x32xf32>
    %cst_8 = arith.constant dense<0.000000e+00> : vector<32x128xf32>
    %13 = tpu.matmul %12, %11, %cst_8 {dimension_numbers = #tpu.dot_dimension_numbers<[1], [0], [0], [1], [0, 0, 1, 1], [], []>} : vector<32x32xf32>, vector<32x128xf32>, vector<32x128xf32> -> vector<32x128xf32>
    %c0_9 = arith.constant 0 : index
    %c0_10 = arith.constant 0 : index
    %14 = vector.load %arg5[%c0_9, %c0_10] : memref<32x1xf32, #tpu.memory_space<vmem>>, vector<32x1xf32>
    %15 = vector.broadcast %14 : vector<32x1xf32> to vector<32x128xf32>
    %16 = arith.addf %13, %15 : vector<32x128xf32>
    %17 = arith.negf %16 : vector<32x128xf32>
    %18 = math.exp %17 : vector<32x128xf32>
    %cst_11 = arith.constant 1.000000e+00 : f32
    %19 = vector.broadcast %cst_11 : f32 to vector<32x128xf32>
    %20 = arith.addf %19, %18 : vector<32x128xf32>
    %21 = arith.divf %19, %20 : vector<32x128xf32>
    %22 = arith.mulf %16, %21 : vector<32x128xf32>
    %c0_12 = arith.constant 0 : index
    %c0_13 = arith.constant 0 : index
    %23 = vector.load %arg6[%c0_12, %c0_13] : memref<32x32xf32, #tpu.memory_space<vmem>>, vector<32x32xf32>
    %cst_14 = arith.constant dense<0.000000e+00> : vector<32x128xf32>
    %24 = tpu.matmul %23, %22, %cst_14 {dimension_numbers = #tpu.dot_dimension_numbers<[1], [0], [0], [1], [0, 0, 1, 1], [], []>} : vector<32x32xf32>, vector<32x128xf32>, vector<32x128xf32> -> vector<32x128xf32>
    %c0_15 = arith.constant 0 : index
    %c0_16 = arith.constant 0 : index
    %25 = vector.load %arg7[%c0_15, %c0_16] : memref<32x1xf32, #tpu.memory_space<vmem>>, vector<32x1xf32>
    %26 = vector.broadcast %25 : vector<32x1xf32> to vector<32x128xf32>
    %27 = arith.addf %24, %26 : vector<32x128xf32>
    %28 = arith.negf %27 : vector<32x128xf32>
    %29 = math.exp %28 : vector<32x128xf32>
    %cst_17 = arith.constant 1.000000e+00 : f32
    %30 = vector.broadcast %cst_17 : f32 to vector<32x128xf32>
    %31 = arith.addf %30, %29 : vector<32x128xf32>
    %32 = arith.divf %30, %31 : vector<32x128xf32>
    %33 = arith.mulf %27, %32 : vector<32x128xf32>
    %c0_18 = arith.constant 0 : index
    %c0_19 = arith.constant 0 : index
    %34 = vector.load %arg8[%c0_18, %c0_19] : memref<1x32xf32, #tpu.memory_space<vmem>>, vector<1x32xf32>
    %cst_20 = arith.constant dense<0.000000e+00> : vector<1x128xf32>
    %35 = tpu.matmul %34, %33, %cst_20 {dimension_numbers = #tpu.dot_dimension_numbers<[1], [0], [0], [1], [0, 0, 1, 1], [], []>} : vector<1x32xf32>, vector<32x128xf32>, vector<1x128xf32> -> vector<1x128xf32>
    %c0_21 = arith.constant 0 : index
    %c0_22 = arith.constant 0 : index
    %36 = vector.load %arg9[%c0_21, %c0_22] : memref<1x1xf32, #tpu.memory_space<vmem>>, vector<1x1xf32>
    %37 = vector.broadcast %36 : vector<1x1xf32> to vector<1x128xf32>
    %38 = arith.addf %35, %37 : vector<1x128xf32>
    %c0_23 = arith.constant 0 : index
    %c0_24 = arith.constant 0 : index
    %39 = vector.load %arg10[%c0_23, %c0_24] : memref<1x128xf32, #tpu.memory_space<vmem>>, vector<1x128xf32>
    tpu.vector_store %arg10[%c0_23, %c0_24], %38 {strides = array<i32>} : memref<1x128xf32, #tpu.memory_space<vmem>>, vector<1x128xf32>,
    return
  }
  func.func @transform_0(%arg0: i32) -> (i32, i32) {
    %c0_i32 = arith.constant 0 : i32
    %c0_i32_0 = arith.constant 0 : i32
    return %c0_i32, %arg0 : i32, i32
  }
  func.func @transform_1(%arg0: i32) -> (i32, i32) {
    %c0_i32 = arith.constant 0 : i32
    %c0_i32_0 = arith.constant 0 : i32
    %c0_i32_1 = arith.constant 0 : i32
    return %c0_i32, %c0_i32_0 : i32, i32
  }
  func.func @transform_2(%arg0: i32) -> (i32, i32) {
    %c0_i32 = arith.constant 0 : i32
    %c0_i32_0 = arith.constant 0 : i32
    %c0_i32_1 = arith.constant 0 : i32
    return %c0_i32, %c0_i32_0 : i32, i32
  }
  func.func @transform_3(%arg0: i32) -> (i32, i32) {
    %c0_i32 = arith.constant 0 : i32
    %c0_i32_0 = arith.constant 0 : i32
    %c0_i32_1 = arith.constant 0 : i32
    return %c0_i32, %c0_i32_0 : i32, i32
  }
  func.func @transform_4(%arg0: i32) -> (i32, i32) {
    %c0_i32 = arith.constant 0 : i32
    %c0_i32_0 = arith.constant 0 : i32
    %c0_i32_1 = arith.constant 0 : i32
    return %c0_i32, %c0_i32_0 : i32, i32
  }
  func.func @transform_5(%arg0: i32) -> (i32, i32) {
    %c0_i32 = arith.constant 0 : i32
    %c0_i32_0 = arith.constant 0 : i32
    %c0_i32_1 = arith.constant 0 : i32
    return %c0_i32, %c0_i32_0 : i32, i32
  }
  func.func @transform_6(%arg0: i32) -> (i32, i32) {
    %c0_i32 = arith.constant 0 : i32
    %c0_i32_0 = arith.constant 0 : i32
    %c0_i32_1 = arith.constant 0 : i32
    return %c0_i32, %c0_i32_0 : i32, i32
  }
  func.func @transform_7(%arg0: i32) -> (i32, i32) {
    %c0_i32 = arith.constant 0 : i32
    %c0_i32_0 = arith.constant 0 : i32
    %c0_i32_1 = arith.constant 0 : i32
    return %c0_i32, %c0_i32_0 : i32, i32
  }
  func.func @transform_8(%arg0: i32) -> (i32, i32) {
    %c0_i32 = arith.constant 0 : i32
    %c0_i32_0 = arith.constant 0 : i32
    %c0_i32_1 = arith.constant 0 : i32
    return %c0_i32, %c0_i32_0 : i32, i32
  }
  func.func @transform_9(%arg0: i32) -> (i32, i32) {
    %c0_i32 = arith.constant 0 : i32
    %c0_i32_0 = arith.constant 0 : i32
    return %c0_i32, %arg0 : i32, i32
  }
}

</mosaic_0001>

<bundles_post_ra>
// kernel: tpu_custom_call.1
= control target key start
LH: loop header
LB: loop body
LE: loop exit
PB: predicated region body
PF: predicated region fallthrough
CT: control target
= control target key end

     0   :  { %s1480_s0 = inlined_call_operand.vmem [shape: f32[3,384], index: 0, kind: input, shape index: {}]   ;;  %s1481_s1 = inlined_call_operand.vmem [shape: f32[32,3], index: 1, kind: input, shape index: {}]   ;;  %s1482_s2 = inlined_call_operand.vmem [shape: f32[32,1], index: 2, kind: input, shape index: {}]   ;;  %s1483_s3 = inlined_call_operand.vmem [shape: f32[32,32], index: 3, kind: input, shape index: {}]   ;;  %s1484_s4 = inlined_call_operand.vmem [shape: f32[32,1], index: 4, kind: input, shape index: {}]   ;;  %s1485_s5 = inlined_call_operand.vmem [shape: f32[32,32], index: 5, kind: input, shape index: {}]   ;;  %s1486_s6 = inlined_call_operand.vmem [shape: f32[32,1], index: 6, kind: input, shape index: {}]   ;;  %s1487_s7 = inlined_call_operand.vmem [shape: f32[1,32], index: 7, kind: input, shape index: {}]   ;;  %s1488_s8 = inlined_call_operand.<no memory space> [shape: f32[1,1], index: 8, kind: input, shape index: {}]   ;;  %s1489_s9 = inlined_call_operand.hbm [shape: f32[1,384], index: 9, kind: output, shape index: {}]  }
   0x1   :  { %v14_v0 = vstv %s1488_s8 }
   0x2   :  { %15 = vst [vmem:[#allocation2] sm:$0x1] %v14_v0 }
   0x3   :  { %16 = vsyncpa [#allocation4], 0 }
   0x4   :  { %18 = vsyncpa [#allocation4 + $0x1], 0  ;;  %s1292_s11 = smov 0   ;;  %s1294_s12 = smov 0  }
   0x5   :  { %s1296_s13 = smov 0   ;;  %s1298_s14 = smov 0  }
   0x6 LB: > { %s1313_s8 = sadd.s32 4294967295, %s1232_s14   ;;  %s948_s15 = sadd.s32 4294967294, %s1232_s14   ;;  %s1232_s14 = sphi %s1298_s14, %s1495_s14   ;;  %s1228_s13 = sphi %s1296_s13, %s1494_s13   ;;  %s1224_s12 = sphi %s1294_s12, %s1493_s12   ;;  %s1220_s11 = sphi %s1292_s11, %s1492_s11  }
   0x7   : > { %s1317_s16 = sadd.s32 1, %s1232_s14   ;;  %s225_s17 = sadd.s32 1, %s1228_s13 }
   0x8   : > { %s222_s18 = ssub.s32 %s1232_s14, %s1317_s16  ;;  %p235_p0 = scmp.ne.s32.totalorder %s1228_s13, %s1224_s12 }
   0x9   : > { %p223_p1 = scmp.eq.s32.totalorder %s222_s18, 0  ;;  %p236_p2 = scmp.eq.s32.totalorder %s1313_s8, 2 }
   0xa   : > { %p241_p3 = scmp.ne.s32.totalorder %s1224_s12, %s1220_s11  ;;  %p242_p4 = scmp.eq.s32.totalorder %s948_s15, 2 }
   0xb   : > { %s1328_s19 = scalar_select %p223_p1, %s1228_s13, %s225_s17  }
   0xc   : > { %p1330_p5 = por %p236_p2, %p235_p0  ;;  %p1334_p6 = por %p242_p4, %p241_p3 }
   0xd   : > { %p951_p7 = scmp.ge.s32.totalorder %s1232_s14, 1  ;;  %p291_p8 = scmp.lt.s32.totalorder %s1232_s14, 4 }
   0xf   : > { %p292_p9 = pnand %p951_p7, %p291_p8 }
  0x10   : > { %p325_p10 = scmp.lt.s32.totalorder (!%p292_p9), %s1313_s8, 2  ;;  %v330_v1 = vld [vmem:[%s1481_s1] sm:$0xff] (!%p292_p9)  ;;  %vm358_vm0 = vcmask (!%p292_p9), 23552   ;;  %v1234_v3 = vmov (!%p292_p9), 0   ;;  %v336_v4 = vld [vmem:[%s1482_s2 + $0x10] sm:$0xff] (!%p292_p9)  ;;  %vm371_vm1 = vcmask (!%p292_p9), 1042432  }
  0x11   : > { %295 = sbr.rel (%p292_p9) target bundleno = 1017 (0x3f9), region = 56  ;;  %1010 = vmatprep.mubr.msk.f32.mxu0 (!%p292_p9), %vm358_vm0, %v330_v1  ;;  %v334_v2 = vld [vmem:[%s1482_s2] sm:$0xff] (!%p292_p9)  ;;  %1120 = vset.pattern.permute.xlu0 (!%p292_p9), %v1234_v3  ;;  %v335_v5 = vld [vmem:[%s1482_s2 + $0x8] sm:$0xff] (!%p292_p9)  ;;  %v337_v6 = vld [vmem:[%s1482_s2 + $0x18] sm:$0xff] (!%p292_p9)  ;;  %vm516_vm2 = vcmask (!%p292_p9), 261120   ;;  %vm1236_vm3 = vmmov (!%p292_p9), 0  }
  0x12   : > { %1121 = vset.pattern.permute.xlu1 (!%p292_p9), %v1234_v3  ;;  %340 = vperm.xlu0 (!%p292_p9), %1120, %v334_v2   ;;  %v331_v8 = vld [vmem:[%s1481_s1 + $0x8] sm:$0xff] (!%p292_p9)  ;;  %v332_v9 = vld [vmem:[%s1481_s1 + $0x10] sm:$0xff] (!%p292_p9)  ;;  %v492_v10 = vld [vmem:[%s1484_s4] sm:$0xff] (!%p292_p9)  ;;  %s323_s25 = sand.u32 (!%p292_p9), 1, %s1224_s12  }
  0x13   : > { %350 = vperm.xlu1 (!%p292_p9), %1121, %v336_v4   ;;  %v493_v11 = vld [vmem:[%s1484_s4 + $0x8] sm:$0xff] (!%p292_p9)  ;;  %v333_v12 = vld [vmem:[%s1481_s1 + $0x18] sm:$0xff] (!%p292_p9)  ;;  %v494_v13 = vld [vmem:[%s1484_s4 + $0x10] sm:$0xff] (!%p292_p9)  ;;  %s324_s27 = scalar_lea.vmem (!%p292_p9), [#allocation3], %s323_s25  ;;  %s881_s15 = scalar_lea.sflag (!%p292_p9), [#allocation4], %s323_s25 }
  0x14   : > { %v495_v14 = vld [vmem:[%s1484_s4 + $0x18] sm:$0xff] (!%p292_p9)  ;;  %v646_v15 = vld [vmem:[%s1486_s6] sm:$0xff] (!%p292_p9)  ;;  %v647_v16 = vld [vmem:[%s1486_s6 + $0x8] sm:$0xff] (!%p292_p9)  ;;  %s893_s28 = sshll.u32 (!%p292_p9), %s324_s27, 4  ;;  %s1440_s28 = int_to_ptr.vmem [resolvable:$true] %s893_s28 }
  0x15   : > { %v648_v17 = vld [vmem:[%s1486_s6 + $0x10] sm:$0xff] (!%p292_p9)  ;;  %v649_v18 = vld [vmem:[%s1486_s6 + $0x18] sm:$0xff] (!%p292_p9)  ;;  %v796_v19 = vld [vmem:[#allocation2] sm:$0x1] (!%p292_p9)  ;;  %s1170_s17 = scalar_lea.vmem (!%p292_p9), %s1440_s28, 16 }
  0x16   : > { %345 = vperm.xlu0 (!%p292_p9), %1120, %v335_v5   ;;  %v488_v20 = vld [vmem:[%s1483_s3] sm:$0xff] (!%p292_p9)  ;;  %v489_v55 = vld [vmem:[%s1483_s3 + $0x8] sm:$0xff] (!%p292_p9)  ;;  %v490_v56 = vld [vmem:[%s1483_s3 + $0x10] sm:$0xff] (!%p292_p9)  ;;  %p1171_p11 = scmp.ne.s32.totalorder (!%p292_p9), %s1440_s28, %s1170_s17 }
  0x17   : > { %355 = vperm.xlu1 (!%p292_p9), %1121, %v337_v6   ;;  %1024 = vmatprep.mubr.msk.f32.mxu1 (!%p292_p9), %vm516_vm2, %v488_v20  ;;  %v491_v57 = vld [vmem:[%s1483_s3 + $0x18] sm:$0xff] (!%p292_p9)  ;;  %v642_v58 = vld [vmem:[%s1485_s5] sm:$0xff] (!%p292_p9) }
  0x18   : > { %s326_s26 = scalar_select %p325_p10, %s1313_s8, 2 }
  0x19   : > { %p1172_p12 = pnand %p1171_p11, %p1330_p5 }
  0x1a   : > { %s952_s29 = sshll.u32 %s326_s26, 2  ;;  %498 = vperm.xlu0 %1120, %v492_v10   ;;  %s979_s26 = sshll.u32 %s1313_s8, 4 }
  0x1b   : > { %s328_s18 = scalar_lea.vmem %s1480_s0, %s952_s29  ;;  %503 = vperm.xlu1 %1121, %v493_v11   ;;  %s1438_s10 = scalar_lea.hbm %s1489_s9, %s979_s26 }
  0x1c   : > { %v329_v7 = vld [vmem:[%s328_s18] sm:$0x7]  ;;  %p1173_p13 = pneg %p1172_p12  ;;  %s1238_s8 = smov [#allocation3]  }
  0x1d   : > { %1008 = vmatprep.subr.msk.mxu0 %vm371_vm1, %v329_v7  ;;  %s1174_s18 = sshll.u32 %s1238_s8, 4  ;;  %s1175_s18 = int_to_ptr.vmem [resolvable:$false] %s1174_s18 }
  0x1e   : > { %1009 = vmatpush3.msk.msra.mxu0 %vm371_vm1, %v329_v7  ;;  %508 = vperm.xlu0 %1120, %v494_v13   ;;  %s1176_s22 = scalar_lea.vmem %s1175_s18, 32  ;;  %p1177_p0 = scmp.lt.s32.totalorder %s1440_s28, %s1175_s18 }
  0x1f   : > { %1011 = vmatmul.mubr.msk.f32.vlgmr.msra.gmra.mrb[0].mxu0 %vm358_vm0, %v331_v8  ;;  %513 = vperm.xlu1 %1121, %v495_v14   ;;  %p1178_p1 = scmp.lt.s32.totalorder %s1176_s22, %s1170_s17 }
  0x20   : > { %1013 = vmatprep.mubr.msk.f32.mxu0 %vm358_vm0, %v332_v9 }
  0x21   : > { %p1179_p2 = por %p1178_p1, %p1177_p0 }
  0x22   : > { %652 = vperm.xlu0 %1120, %v646_v15  }
  0x23   : > { %1014 = vmatmul.mubr.msk.f32.gmra.mrb[2].mxu0 %vm358_vm0, %v333_v12  ;;  %657 = vperm.xlu1 %1121, %v647_v16   ;;  %p1180_p3 = pnand %p1179_p2, %p1173_p13 }
  0x24   : > { %1038 = vmatprep.mubr.msk.f32.mxu0 %vm516_vm2, %v642_v58 }
  0x26   : > { %662 = vperm.xlu0 %1120, %v648_v17  }
  0x27   : > { %667 = vperm.xlu1 %1121, %v649_v18  }
  0x2a   : > { %799 = vperm.xlu0 %1120, %v796_v19  }
  0x91   : > { %v341_v21 = vpop.permute.xlu0 %340 }
  0x92   : > { %v351_v22 = vpop.permute.xlu1 %350 }
  0x95   : > { %v346_v23 = vpop.permute.xlu0 %345 }
  0x96   : > { %v356_v29 = vpop.permute.xlu1 %355 }
  0x99   : > { %v499_v60 = vpop.permute.xlu0 %498 }
  0x9a   : > { %v504_v59 = vpop.permute.xlu1 %503 }
  0x9d   : > { %v509_v5 = vpop.permute.xlu0 %508 }
  0x9e   : > { %v514_v2 = vpop.permute.xlu1 %513 }
  0xf2   : > { %v1012_v24 = vpop.f32.mrb[0].mxu0 }
  0xf3   : > { %v447_v25 = vadd.f32 %v1012_v24, %v346_v23  ;;  %v441_v26 = vpop.f32.mrb[1].mxu0 }
  0xf4   : > { %v442_v27 = vadd.f32 %v441_v26, %v341_v21 }
  0xf5   : > { %v959_v28 = vmul.f32 -1.442695, %v447_v25 }
  0xf6   : > { %v958_v30 = vmul.f32 -1.442695, %v442_v27  ;;  %v1015_v31 = vpop.f32.mrb[2].mxu0 }
  0xf7   : > { %1122 = vpow2.f32 %v959_v28  ;;  %v457_v32 = vadd.f32 %v1015_v31, %v356_v29  ;;  %v451_v33 = vpop.f32.mrb[3].mxu0  ;;  %v643_v29 = vld [vmem:[%s1485_s5 + $0x8] sm:$0xff]  ;;  %v645_v31 = vld [vmem:[%s1485_s5 + $0x18] sm:$0xff] }
  0xf8   : > { %1124 = vpow2.f32 %v958_v30  ;;  %v452_v34 = vadd.f32 %v451_v33, %v351_v22  ;;  %v644_v30 = vld [vmem:[%s1485_s5 + $0x10] sm:$0xff]  ;;  %v1237_v33 = vmov 0.0  }
  0xf9   : > { %v961_v35 = vmul.f32 -1.442695, %v457_v32 }
  0xfa   : > { %v960_v36 = vmul.f32 -1.442695, %v452_v34 }
  0xfb   : > { %1126 = vpow2.f32 %v961_v35  ;;  %v653_v35 = vpop.permute.xlu0 %652 }
  0xfc   : > { %1128 = vpow2.f32 %v960_v36 }
 0x101   : > { %v1123_v37 = vpop.eup %1122 }
 0x102   : > { %v1125_v38 = vpop.eup %1124  ;;  %v473_v39 = vadd.f32 1.0, %v1123_v37 }
 0x103   : > { %v472_v40 = vadd.f32 1.0, %v1125_v38 }
 0x104   : > { %1130 = vrcp.f32 %v473_v39 }
 0x105   : > { %v1127_v41 = vpop.eup %1126  ;;  %1132 = vrcp.f32 %v472_v40 }
 0x106   : > { %v1129_v42 = vpop.eup %1128  ;;  %v475_v43 = vadd.f32 1.0, %v1127_v41 }
 0x107   : > { %v474_v44 = vadd.f32 1.0, %v1129_v42 }
 0x108   : > { %1134 = vrcp.f32 %v475_v43 }
 0x109   : > { %1136 = vrcp.f32 %v474_v44  ;;  %v663_v44 = vpop.permute.xlu0 %662 }
 0x10e   : > { %v1131_v45 = vpop.eup %1130 }
 0x10f   : > { %v1133_v46 = vpop.eup %1132  ;;  %v485_v47 = vmul.f32 %v1131_v45, %v447_v25 }
 0x110   : > { %v484_v48 = vmul.f32 %v1133_v46, %v442_v27 }
 0x112   : > { %v1135_v49 = vpop.eup %1134  ;;  %v1055_v50 = vpack.c.bf16 %v485_v47, %v484_v48 }
 0x113   : > { %v1137_v51 = vpop.eup %1136  ;;  %v487_v52 = vmul.f32 %v1135_v49, %v457_v32  ;;  %v1235_v32 = vmov 0.0|0.0  }
 0x114   : > { %v486_v53 = vmul.f32 %v1137_v51, %v452_v34  ;;  %1056 = vmatprep.subr.bf16.mxu1 %v1055_v50  ;;  %v658_v34 = vpop.permute.xlu1 %657 }
 0x115   : > { %1058 = vmatpush3.bf16.msra.mxu1 %v1055_v50 }
 0x116   : > { %v1059_v54 = vpack.c.bf16 %v487_v52, %v486_v53 }
 0x118   : > { %1060 = vmatprep.subr.bf16.mxu1 %v1059_v54  ;;  %v668_v41 = vpop.permute.xlu1 %667 }
 0x119   : > { %1062 = vmatpush3.bf16.msra.mxu1 %v1059_v54 }
 0x11a   : > { %1071 = vmatprep.subr.bf16.mxu1 %v1235_v32 }
 0x11c   : > { %1025 = vmatmul.mubr.msk.f32.vlgmr.msra.gmra.mrb[0].mxu1 %vm516_vm2, %v489_v55 }
 0x11d   : > { %1027 = vmatprep.mubr.msk.f32.mxu1 %vm516_vm2, %v490_v56 }
 0x120   : > { %1028 = vmatmul.mubr.msk.f32.gmra.mrb[2].mxu1 %vm516_vm2, %v491_v57 }
 0x121   : > { %1052 = vmatprep.mubr.msk.f32.mxu1 %vm1236_vm3, %v1237_v33 }
 0x1ef   : > { %v1026_v61 = vpop.f32.mrb[0].mxu1 }
 0x1f0   : > { %v601_v62 = vadd.f32 %v1026_v61, %v504_v59  ;;  %v595_v63 = vpop.f32.mrb[1].mxu1 }
 0x1f1   : > { %v596_v0 = vadd.f32 %v595_v63, %v499_v60 }
 0x1f2   : > { %v967_v1 = vmul.f32 -1.442695, %v601_v62 }
 0x1f3   : > { %v966_v3 = vmul.f32 -1.442695, %v596_v0  ;;  %v1029_v4 = vpop.f32.mrb[2].mxu1 }
 0x1f4   : > { %1138 = vpow2.f32 %v967_v1  ;;  %v611_v6 = vadd.f32 %v1029_v4, %v514_v2  ;;  %v605_v7 = vpop.f32.mrb[3].mxu1  ;;  %v795_v4 = vld [vmem:[%s1487_s7] sm:$0x1] }
 0x1f5   : > { %1140 = vpow2.f32 %v966_v3  ;;  %v606_v8 = vadd.f32 %v605_v7, %v509_v5  ;;  %v802_v5 = vlaneseq }
 0x1f6   : > { %v969_v9 = vmul.f32 -1.442695, %v611_v6 }
 0x1f7   : > { %v968_v10 = vmul.f32 -1.442695, %v606_v8 }
 0x1f8   : > { %1142 = vpow2.f32 %v969_v9 }
 0x1f9   : > { %1144 = vpow2.f32 %v968_v10 }
 0x1fe   : > { %v1139_v11 = vpop.eup %1138 }
 0x1ff   : > { %v1141_v12 = vpop.eup %1140  ;;  %v627_v13 = vadd.f32 1.0, %v1139_v11 }
 0x200   : > { %v626_v14 = vadd.f32 1.0, %v1141_v12 }
 0x201   : > { %1146 = vrcp.f32 %v627_v13 }
 0x202   : > { %v1143_v15 = vpop.eup %1142  ;;  %1148 = vrcp.f32 %v626_v14 }
 0x203   : > { %v1145_v16 = vpop.eup %1144  ;;  %v629_v17 = vadd.f32 1.0, %v1143_v15 }
 0x204   : > { %v628_v18 = vadd.f32 1.0, %v1145_v16 }
 0x205   : > { %1150 = vrcp.f32 %v629_v17 }
 0x206   : > { %1152 = vrcp.f32 %v628_v18 }
 0x20b   : > { %v1147_v19 = vpop.eup %1146 }
 0x20c   : > { %v1149_v20 = vpop.eup %1148  ;;  %v639_v21 = vmul.f32 %v1147_v19, %v601_v62 }
 0x20d   : > { %v638_v22 = vmul.f32 %v1149_v20, %v596_v0 }
 0x20f   : > { %v1151_v23 = vpop.eup %1150  ;;  %v1063_v24 = vpack.c.bf16 %v639_v21, %v638_v22 }
 0x210   : > { %v1153_v25 = vpop.eup %1152  ;;  %v641_v26 = vmul.f32 %v1151_v23, %v611_v6  ;;  %v803_v6 = vshrl.u32 %v802_v5, 7 }
 0x211   : > { %v640_v27 = vmul.f32 %v1153_v25, %v606_v8  ;;  %1064 = vmatprep.subr.bf16.mxu0 %v1063_v24  ;;  %v800_v8 = vpop.permute.xlu0 %799 }
 0x212   : > { %1066 = vmatpush3.bf16.msra.mxu0 %v1063_v24  ;;  %v804_v7 = vsub.s32 0, %v803_v6 }
 0x213   : > { %v1067_v28 = vpack.c.bf16 %v641_v26, %v640_v27 }
 0x214   : > { %v805_v9 = vrot.slane %v800_v8, %v804_v7 }
 0x215   : > { %1068 = vmatprep.subr.bf16.mxu0 %v1067_v28 }
 0x216   : > { %1070 = vmatpush3.bf16.msra.mxu0 %v1067_v28 }
 0x219   : > { %1039 = vmatmul.mubr.msk.f32.vlgmr.msra.gmra.mrb[4].mxu0 %vm516_vm2, %v643_v29 }
 0x21a   : > { %1041 = vmatprep.mubr.msk.f32.mxu0 %vm516_vm2, %v644_v30 }
 0x21d   : > { %1042 = vmatmul.mubr.msk.f32.gmra.mrb[6].mxu0 %vm516_vm2, %v645_v31 }
 0x2ec   : > { %v1040_v36 = vpop.f32.mrb[4].mxu0 }
 0x2ed   : > { %v754_v37 = vadd.f32 %v1040_v36, %v658_v34  ;;  %v748_v38 = vpop.f32.mrb[5].mxu0 }
 0x2ee   : > { %v749_v39 = vadd.f32 %v748_v38, %v653_v35 }
 0x2ef   : > { %v975_v40 = vmul.f32 -1.442695, %v754_v37 }
 0x2f0   : > { %v974_v42 = vmul.f32 -1.442695, %v749_v39  ;;  %v1043_v43 = vpop.f32.mrb[6].mxu0 }
 0x2f1   : > { %1154 = vpow2.f32 %v975_v40  ;;  %v764_v45 = vadd.f32 %v1043_v43, %v668_v41  ;;  %v758_v46 = vpop.f32.mrb[7].mxu0 }
 0x2f2   : > { %1156 = vpow2.f32 %v974_v42  ;;  %v759_v47 = vadd.f32 %v758_v46, %v663_v44 }
 0x2f3   : > { %v977_v48 = vmul.f32 -1.442695, %v764_v45 }
 0x2f4   : > { %v976_v49 = vmul.f32 -1.442695, %v759_v47 }
 0x2f5   : > { %1158 = vpow2.f32 %v977_v48 }
 0x2f6   : > { %1160 = vpow2.f32 %v976_v49 }
 0x2fb   : > { %v1155_v50 = vpop.eup %1154 }
 0x2fc   : > { %v1157_v51 = vpop.eup %1156  ;;  %v780_v52 = vadd.f32 1.0, %v1155_v50 }
 0x2fd   : > { %v779_v53 = vadd.f32 1.0, %v1157_v51 }
 0x2fe   : > { %1162 = vrcp.f32 %v780_v52 }
 0x2ff   : > { %v1159_v54 = vpop.eup %1158  ;;  %1164 = vrcp.f32 %v779_v53 }
 0x300   : > { %v1161_v55 = vpop.eup %1160  ;;  %v782_v56 = vadd.f32 1.0, %v1159_v54 }
 0x301   : > { %v781_v57 = vadd.f32 1.0, %v1161_v55 }
 0x302   : > { %1166 = vrcp.f32 %v782_v56 }
 0x303   : > { %1168 = vrcp.f32 %v781_v57 }
 0x308   : > { %v1163_v58 = vpop.eup %1162 }
 0x309   : > { %v1165_v59 = vpop.eup %1164  ;;  %v792_v60 = vmul.f32 %v1163_v58, %v754_v37 }
 0x30a   : > { %v791_v61 = vmul.f32 %v1165_v59, %v749_v39 }
 0x30c   : > { %v1167_v62 = vpop.eup %1166  ;;  %v1072_v63 = vpack.c.bf16 %v792_v60, %v791_v61 }
 0x30d   : > { %v1169_v0 = vpop.eup %1168  ;;  %v794_v1 = vmul.f32 %v1167_v62, %v764_v45 }
 0x30e   : > { %v793_v2 = vmul.f32 %v1169_v0, %v759_v47  ;;  %1073 = vmatpush3.bf16.msra.mxu1 %v1072_v63 }
 0x30f   : > { %1074 = vmatprep.subr.bf16.mxu1 %v1235_v32 }
 0x310   : > { %v1075_v3 = vpack.c.bf16 %v794_v1, %v793_v2 }
 0x312   : > { %1076 = vmatpush3.bf16.msra.mxu1 %v1075_v3 }
 0x315   : > { %1053 = vmatmul.mubr.msk.f32.vlgmr.msra.gmra.mrb[4].mxu1 %vm516_vm2, %v795_v4 }
 0x3e8   : > { %v875_v10 = vpop.f32.mrb[4].mxu1 }
 0x3e9   : > { %v876_v11 = vadd.f32 %v875_v10, %v805_v9  ;;  %v1054_v12 = vpop.f32.mrb[5].mxu1 }
 0x3eb   : > { %879 = vst [vmem:[%s324_s27] sm:$0x1] %v876_v11 }
 0x3ec   : > { %1183 = shalt.err (!%p1180_p3)
}
 0x3ed   : > { %s1184_s23 = scalar_lea.hbm %s1438_s10, 16  ;;  %s1188_s26 = scalar_lea.hbm %s1489_s9, 48 }
 0x3ee   : > { %p1185_p4 = scmp.ne.s32.totalorder %s1438_s10, %s1184_s23  ;;  %p1189_p9 = scmp.lt.u32.totalorder %s1438_s10, %s1489_s9 }
 0x3ef   : > { %p1190_p10 = scmp.lt.u32.totalorder %s1188_s26, %s1184_s23  ;;  %p1192_p12 = scmp.lt.u32.totalorder %s1184_s23, %s1438_s10 }
 0x3f0   : > { %p1186_p7 = pnand %p1185_p4, %p1330_p5 }
 0x3f1   : > { %p1191_p11 = por %p1190_p10, %p1189_p9 }
 0x3f2   : > { %p1187_p8 = pneg %p1186_p7 }
 0x3f3   : > { %p1193_p13 = por %p1192_p12, %p1191_p11 }
 0x3f5   : > { %p1194_p0 = pnand %p1193_p13, %p1187_p8 }
 0x3f7   : > { %1197 = shalt.err (!%p1194_p0)
}
 0x3f8   : > { %1077 = dma.vmem_to_hbm [thread:$0]  (%p1330_p5), %s1440_s28, 16, %s1438_s10, %s881_s15  }
 0x3f9 PF: > { %p1083_p1 = scmp.ge.s32.totalorder %s1232_s14, 2  ;;  %s905_s29 = sand.u32 1, %s1220_s11  }
 0x3fa   : > { %s906_s17 = scalar_lea.sflag [#allocation4], %s905_s29 }
 0x3fb   : > { %p1080_p2 = pnand %p1083_p1, %p1334_p6 }
 0x3fd   : > { %1215 = dma.done.wait (!%p1080_p2), %s906_s17, 16  }
 0x3fe   : > { %1217 = vsyncadd (!%p1080_p2), %s906_s17, 4294967280  ;;  %p21_p3 = scmp.ge.s32.totalorder %s1317_s16, 5   ;;  %s1492_s11 = smov %s1224_s12 }
 0x3ff   : > { %s1493_s12 = smov %s1228_s13  ;;  %s1494_s13 = smov %s1328_s19 }
 0x400   : > { %s1495_s14 = smov %s1317_s16  ;;  %23 = sbr.rel (!%p21_p3) target bundleno = 6 (0x6), region = 91 }
 0x407   :  { %910 = vsyncpa [#allocation4], 1 }
 0x408   :  { %912 = vsyncpa [#allocation4 + $0x1], 1 }

</bundles_post_ra>
